<compile_context>
chip_gen: v5e
topology: v5e:2x2
jax: 0.10.0
libtpu: 0.0.40
codegen_flags: <defaults>
</compile_context>

<pallas_src>
import functools

import jax
import jax.numpy as jnp
from jax import lax
from jax.experimental import pallas as pl
from jax.experimental.pallas import tpu as pltpu


def _round_up(n, m):
    return ((n + m - 1) // m) * m


def _proj(w_bf16, x_bf16, b_f32):
    """(Cout, Cin) @ (Cin, N) -> (Cout, N); bf16 MXU operands, f32 accumulation."""
    y = lax.dot_general(w_bf16, x_bf16,
                        dimension_numbers=(((1,), (0,)), ((), ())),
                        preferred_element_type=jnp.float32)
    return y + b_f32


def _self_attention_kernel(x_ref, wq_ref, bq_ref, wkv_ref, bkv_ref, gamma_ref,
                           o_ref, kv_scr, *, tq, cq_pad, c, cv1_pad):
    # x_ref:    (1, C, HW)  full x for this batch element (f32; also the residual)
    # wq/bq:    (Cq_pad, C) bf16 / (Cq_pad, 1) f32, zero-padded rows
    # wkv/bkv:  (KV_rows, C) bf16 / (KV_rows, 1) f32 = stacked [Wk ; Wv ; 0],
    #           [bk ; bv ; 1]; the bias-1 / weight-0 row produces an all-ones row.
    # gamma:    (1,) f32 scalar in SMEM
    # kv_scr:   (KV_rows, HW) bf16 scratch = [K ; V ; ones], persists across qi
    qi = pl.program_id(1)

    # Fused K / V / ones projection: once per batch element, reused by every qi tile.
    @pl.when(qi == 0)
    def _():
        x_full = x_ref[0].astype(jnp.bfloat16)                          # (C, HW)
        kv_scr[...] = _proj(wkv_ref[...], x_full, bkv_ref[...]).astype(kv_scr.dtype)

    # Query tile sliced out of the resident full-x block (no second HBM stream).
    start = pl.multiple_of(qi * tq, tq)
    x_q = x_ref[0, :, pl.ds(start, tq)]                                 # (C, TQ) f32
    q = _proj(wq_ref[...], x_q.astype(jnp.bfloat16), bq_ref[...])       # (Cq_pad, TQ)

    k = kv_scr[pl.ds(0, cq_pad), :]                                     # (Cq_pad, HW)
    # scores[i, j] = sum_c q[c, i] * k[c, j]; zero-padded Cq rows contribute 0.
    s = lax.dot_general(q.astype(jnp.bfloat16), k,
                        dimension_numbers=(((0,), (0,)), ((), ())),
                        preferred_element_type=jnp.float32)             # (TQ, HW)

    # Unnormalized softmax numerator (normalization folded in after the PV matmul).
    s = s - jnp.max(s, axis=-1, keepdims=True)
    p = jnp.exp(s).astype(jnp.bfloat16)                                 # (TQ, HW)

    # [V ; ones] @ p^T -> (Cv1_pad, TQ): row `c` is the softmax row-sum, already in
    # (1, TQ) lane layout (no XLU transpose of a (TQ, 1) reduction needed).
    v_ext = kv_scr[pl.ds(cq_pad, cv1_pad), :]                           # (Cv1_pad, HW)
    out_ext = lax.dot_general(v_ext, p,
                              dimension_numbers=(((1,), (1,)), ((), ())),
                              preferred_element_type=jnp.float32)       # (Cv1_pad, TQ)
    out_v = out_ext[:c]                                                 # (C, TQ)
    row_sum = out_ext[c:c + 1]                                          # (1, TQ)

    # gamma * softmax(qk) @ v + x, with the 1/row_sum fused into the gamma gate.
    scale = gamma_ref[0] * pl.reciprocal(row_sum, approx=True)          # (1, TQ)
    o_ref[0] = (out_v * scale + x_q).astype(o_ref.dtype)


def _pick_tq(hw, max_tq):
    """Largest query tile <= max_tq that divides HW and is a multiple of 128."""
    if hw % 128 != 0:
        return hw  # block == full dim still satisfies the (8,128) tiling rule
    tq = 128
    while tq * 2 <= max_tq and hw % (tq * 2) == 0:
        tq *= 2
    return tq


def self_attention(x_nchw, params, *, tq=None):
    """x_nchw: (B, C, H, W) float32. params = (wq, bq, wk, bk, wv, bv, gamma) with
    wq/wk: (C//8, C), wv: (C, C) (1x1-conv weights squeezed), 1-D biases, gamma (1,).
    Returns (B, C, H, W)."""
    B, C, H, W = x_nchw.shape
    HW = H * W
    wq, bq, wk, bk, wv, bv, gamma = params
    Cq = wq.shape[0]

    # bf16 sublane tile is 16 rows -> pad Q/K projection rows to a multiple of 16.
    Cq_pad = _round_up(max(Cq, 16), 16)
    # V rows + one all-ones row (softmax row sums), padded to 16.
    Cv1_pad = _round_up(C + 1, 16)
    KV_rows = Cq_pad + Cv1_pad

    # Q projection weights: padded rows AND padded biases are zero, so the padded
    # rows of q (and k below) are exactly zero and contribute nothing to q^T k.
    wq_p = jnp.zeros((Cq_pad, C), jnp.float32).at[:Cq].set(wq).astype(jnp.bfloat16)
    bq_p = jnp.zeros((Cq_pad, 1), jnp.float32).at[:Cq, 0].set(bq)

    # Fused [Wk ; Wv ; ones] projection (single MXU pass per batch element).
    # The "ones" row comes from zero weights + bias 1.0.
    wkv = jnp.zeros((KV_rows, C), jnp.float32)
    wkv = wkv.at[:Cq].set(wk).at[Cq_pad:Cq_pad + C].set(wv)
    wkv = wkv.astype(jnp.bfloat16)
    bkv = jnp.zeros((KV_rows, 1), jnp.float32)
    bkv = bkv.at[:Cq, 0].set(bk).at[Cq_pad:Cq_pad + C, 0].set(bv)
    bkv = bkv.at[Cq_pad + C, 0].set(1.0)

    gamma_1 = gamma.reshape(1).astype(jnp.float32)

    # (B, C, H, W) -> (B, C, HW): pure reshape, no HBM transpose.
    x_seq = x_nchw.reshape(B, C, HW)

    # Generation-aware tiling / VMEM budget (v7x: 64 MiB VMEM; v5e/v6e: 128 MiB).
    try:
        vmem_cap = int(pltpu.get_tpu_info().vmem_capacity_bytes)
    except Exception:
        vmem_cap = 128 << 20
    if tq is None:
        tq = _pick_tq(HW, max_tq=256 if vmem_cap <= (64 << 20) else 512)
    assert HW % tq == 0 and (tq % 128 == 0 or tq == HW), "bad query tile size"
    nq = HW // tq

    vmem_est = (2 * C * HW * 4                          # double-buffered x block (f32)
                + KV_rows * HW * 2                      # persistent [K;V;1] scratch
                + 2 * (Cq_pad + KV_rows) * (C + 2) * 4  # weights + biases (dbl-buffered)
                + 2 * 2 * C * tq * 4                    # output tiles (double-buffered)
                + 3 * tq * HW * 4                       # score / prob temporaries
                + (4 << 20))                            # headroom
    vmem_limit = int(min(max(32 << 20, vmem_est), vmem_cap - (4 << 20)))

    kernel = functools.partial(_self_attention_kernel,
                               tq=tq, cq_pad=Cq_pad, c=C, cv1_pad=Cv1_pad)

    out_seq = pl.pallas_call(
        kernel,
        out_shape=jax.ShapeDtypeStruct((B, C, HW), x_nchw.dtype),
        grid=(B, nq),
        in_specs=[
            pl.BlockSpec((1, C, HW),   lambda b, qi: (b, 0, 0)),   # x (full; q tiles sliced in-kernel)
            pl.BlockSpec((Cq_pad, C),  lambda b, qi: (0, 0)),      # Wq (padded, bf16)
            pl.BlockSpec((Cq_pad, 1),  lambda b, qi: (0, 0)),      # bq (padded, f32)
            pl.BlockSpec((KV_rows, C), lambda b, qi: (0, 0)),      # [Wk ; Wv ; 0] bf16
            pl.BlockSpec((KV_rows, 1), lambda b, qi: (0, 0)),      # [bk ; bv ; 1] f32
            pl.BlockSpec(memory_space=pltpu.MemorySpace.SMEM),     # gamma scalar
        ],
        out_specs=pl.BlockSpec((1, C, tq), lambda b, qi: (b, 0, qi)),
        scratch_shapes=[
            pltpu.VMEM((KV_rows, HW), jnp.bfloat16),   # [K ; V ; ones], persists over qi
        ],
        compiler_params=pltpu.CompilerParams(
            dimension_semantics=("parallel", "arbitrary"),
            vmem_limit_bytes=vmem_limit),
    )(x_seq, wq_p, bq_p, wkv, bkv, gamma_1)

    return out_seq.reshape(B, C, H, W)


def _reference(x_nchw, params):
    """Plain-JAX f32 reference mirroring the PyTorch forward exactly."""
    wq, bq, wk, bk, wv, bv, gamma = params
    B, C, H, W = x_nchw.shape
    HW = H * W
    xf = x_nchw.reshape(B, C, HW)                                   # (B, C, HW)
    q = jnp.einsum("oc,bcn->bon", wq, xf) + bq[None, :, None]       # (B, Cq, HW)
    k = jnp.einsum("oc,bcn->bon", wk, xf) + bk[None, :, None]       # (B, Cq, HW)
    v = jnp.einsum("oc,bcn->bon", wv, xf) + bv[None, :, None]       # (B, C,  HW)
    attn = jnp.einsum("bcn,bcm->bnm", q, k)                         # (B, HW, HW)
    attn = jax.nn.softmax(attn, axis=-1)
    out = jnp.einsum("bcn,bmn->bcm", v, attn)                       # (B, C, HW)
    out = out.reshape(B, C, H, W)
    return gamma[0] * out + x_nchw


if __name__ == "__main__":
    B, C, H, W = 2, 16, 16, 16         # HW = 256, Cq = C // 8 = 2
    Cq = C // 8

    key = jax.random.PRNGKey(0)
    kx, kwq, kbq, kwk, kbk, kwv, kbv = jax.random.split(key, 7)

    x = jax.random.normal(kx, (B, C, H, W), dtype=jnp.float32)

    # Deterministic parameter init (shapes from the module's __init__).
    # NOTE: PyTorch inits gamma to 0; we use a nonzero value so the attention
    # path is actually exercised.
    wq = 0.1 * jax.random.normal(kwq, (Cq, C), dtype=jnp.float32)
    bq = 0.1 * jax.random.normal(kbq, (Cq,), dtype=jnp.float32)
    wk = 0.1 * jax.random.normal(kwk, (Cq, C), dtype=jnp.float32)
    bk = 0.1 * jax.random.normal(kbk, (Cq,), dtype=jnp.float32)
    wv = 0.1 * jax.random.normal(kwv, (C, C), dtype=jnp.float32)
    bv = 0.1 * jax.random.normal(kbv, (C,), dtype=jnp.float32)
    gamma = jnp.array([0.5], dtype=jnp.float32)

    params = (wq, bq, wk, bk, wv, bv, gamma)

    # tq=128 -> two query tiles per batch element: exercises both the fused K/V
    # projection step (qi == 0) and the scratch-reuse / in-kernel slicing path (qi == 1).
    y = self_attention(x, params, tq=128)
    y = jax.block_until_ready(y)

    y_ref = _reference(x, params)
    assert y.shape == (B, C, H, W)
    # bf16 MXU operands + approximate reciprocal + bf16 softmax row-sums -> looser
    # tolerance than pure f32.
    assert jnp.allclose(y, y_ref, atol=2e-2, rtol=2e-2), (
        "mismatch vs reference, max abs err = "
        f"{float(jnp.max(jnp.abs(y - y_ref)))}")

    print("KERNEL_OK")
</pallas_src>

<mosaic_0001>
module attributes {stable_mosaic.version = 11 : i64} {
  func.func @_self_attention_kernel(%arg0: i32, %arg1: i32, %arg2: memref<1x16x256xf32, #tpu.memory_space<vmem>>, %arg3: memref<16x16xbf16, #tpu.memory_space<vmem>>, %arg4: memref<16x1xf32, #tpu.memory_space<vmem>>, %arg5: memref<48x16xbf16, #tpu.memory_space<vmem>>, %arg6: memref<48x1xf32, #tpu.memory_space<vmem>>, %arg7: memref<1xf32, #tpu.memory_space<smem>>, %arg8: memref<1x16x128xf32, #tpu.memory_space<vmem>>, %arg9: memref<48x256xbf16, #tpu.memory_space<vmem>>) attributes {dimension_semantics = [#tpu.dimension_semantics<parallel>, #tpu.dimension_semantics<arbitrary>], iteration_bounds = array<i64: 2, 2>, scalar_prefetch = 0 : i64, scratch_operands = 1 : i64, tpu.core_type = #tpu.core_type<tc>, window_params = [{transform_indices = @transform_0, window_bounds = array<i64: 1, 16, 256>}, {pipeline_mode = #tpu.pipeline_mode<synchronous>, transform_indices = @transform_1, window_bounds = array<i64: 16, 16>}, {pipeline_mode = #tpu.pipeline_mode<synchronous>, transform_indices = @transform_2, window_bounds = array<i64: 16, 1>}, {pipeline_mode = #tpu.pipeline_mode<synchronous>, transform_indices = @transform_3, window_bounds = array<i64: 48, 16>}, {pipeline_mode = #tpu.pipeline_mode<synchronous>, transform_indices = @transform_4, window_bounds = array<i64: 48, 1>}, {transform_indices = @transform_5, window_bounds = array<i64: 1>}, {transform_indices = @transform_6, window_bounds = array<i64: 1, 16, 128>}]} {
    %c0_i32 = arith.constant 0 : i32
    %0 = arith.cmpi eq, %arg1, %c0_i32 : i32
    %1 = arith.extui %0 : i1 to i32
    %c0_i32_0 = arith.constant 0 : i32
    %2 = arith.cmpi ne, %1, %c0_i32_0 : i32
    scf.if %2 {
      %c0_16 = arith.constant 0 : index
      %c0_17 = arith.constant 0 : index
      %c0_18 = arith.constant 0 : index
      %37 = vector.load %arg2[%c0_16, %c0_17, %c0_18] : memref<1x16x256xf32, #tpu.memory_space<vmem>>, vector<1x16x256xf32>
      %38 = vector.shape_cast %37 : vector<1x16x256xf32> to vector<16x256xf32>
      %39 = arith.truncf %38 : vector<16x256xf32> to vector<16x256xbf16>
      %c0_19 = arith.constant 0 : index
      %c0_20 = arith.constant 0 : index
      %40 = vector.load %arg5[%c0_19, %c0_20] : memref<48x16xbf16, #tpu.memory_space<vmem>>, vector<48x16xbf16>
      %c0_21 = arith.constant 0 : index
      %c0_22 = arith.constant 0 : index
      %41 = vector.load %arg6[%c0_21, %c0_22] : memref<48x1xf32, #tpu.memory_space<vmem>>, vector<48x1xf32>
      %cst_23 = arith.constant dense<0.000000e+00> : vector<48x256xf32>
      %42 = tpu.matmul %40, %39, %cst_23 {dimension_numbers = #tpu.dot_dimension_numbers<[1], [0], [0], [1], [0, 0, 1, 1], [], []>} : vector<48x16xbf16>, vector<16x256xbf16>, vector<48x256xf32> -> vector<48x256xf32>
      %43 = vector.broadcast %41 : vector<48x1xf32> to vector<48x256xf32>
      %44 = arith.addf %42, %43 : vector<48x256xf32>
      %45 = arith.truncf %44 : vector<48x256xf32> to vector<48x256xbf16>
      %c0_24 = arith.constant 0 : index
      %c0_25 = arith.constant 0 : index
      %46 = vector.load %arg9[%c0_24, %c0_25] : memref<48x256xbf16, #tpu.memory_space<vmem>>, vector<48x256xbf16>
      tpu.vector_store %arg9[%c0_24, %c0_25], %45 {strides = array<i32>} : memref<48x256xbf16, #tpu.memory_space<vmem>>, vector<48x256xbf16>,
    } else {
    }
    %c128_i32 = arith.constant 128 : i32
    %3 = arith.muli %arg1, %c128_i32 : i32
    %4 = tpu.assume_multiple %3, 128 : i32
    %c0 = arith.constant 0 : index
    %c0_1 = arith.constant 0 : index
    %5 = arith.index_cast %4 : i32 to index
    %6 = vector.load %arg2[%c0, %c0_1, %5] : memref<1x16x256xf32, #tpu.memory_space<vmem>>, vector<1x16x128xf32>
    %7 = vector.shape_cast %6 : vector<1x16x128xf32> to vector<16x128xf32>
    %c0_2 = arith.constant 0 : index
    %c0_3 = arith.constant 0 : index
    %8 = vector.load %arg3[%c0_2, %c0_3] : memref<16x16xbf16, #tpu.memory_space<vmem>>, vector<16x16xbf16>
    %9 = arith.truncf %7 : vector<16x128xf32> to vector<16x128xbf16>
    %c0_4 = arith.constant 0 : index
    %c0_5 = arith.constant 0 : index
    %10 = vector.load %arg4[%c0_4, %c0_5] : memref<16x1xf32, #tpu.memory_space<vmem>>, vector<16x1xf32>
    %cst = arith.constant dense<0.000000e+00> : vector<16x128xf32>
    %11 = tpu.matmul %8, %9, %cst {dimension_numbers = #tpu.dot_dimension_numbers<[1], [0], [0], [1], [0, 0, 1, 1], [], []>} : vector<16x16xbf16>, vector<16x128xbf16>, vector<16x128xf32> -> vector<16x128xf32>
    %12 = vector.broadcast %10 : vector<16x1xf32> to vector<16x128xf32>
    %13 = arith.addf %11, %12 : vector<16x128xf32>
    %c0_6 = arith.constant 0 : index
    %c0_7 = arith.constant 0 : index
    %14 = vector.load %arg9[%c0_6, %c0_7] : memref<48x256xbf16, #tpu.memory_space<vmem>>, vector<16x256xbf16>
    %15 = arith.truncf %13 : vector<16x128xf32> to vector<16x128xbf16>
    %cst_8 = arith.constant dense<0.000000e+00> : vector<128x256xf32>
    %16 = tpu.matmul %15, %14, %cst_8 {dimension_numbers = #tpu.dot_dimension_numbers<[0], [0], [1], [1], [0, 1, 1, 1], [], []>} : vector<16x128xbf16>, vector<16x256xbf16>, vector<128x256xf32> -> vector<128x256xf32>
    %cst_9 = arith.constant dense<0xFF800000> : vector<128xf32>
    %17 = vector.multi_reduction <maximumf>, %16, %cst_9 [1] : vector<128x256xf32> to vector<128xf32>
    %18 = vector.shape_cast %17 : vector<128xf32> to vector<128x1xf32>
    %19 = vector.broadcast %18 : vector<128x1xf32> to vector<128x256xf32>
    %20 = arith.subf %16, %19 : vector<128x256xf32>
    %21 = math.exp %20 : vector<128x256xf32>
    %22 = arith.truncf %21 : vector<128x256xf32> to vector<128x256xbf16>
    %c16 = arith.constant 16 : index
    %c0_10 = arith.constant 0 : index
    %23 = vector.load %arg9[%c16, %c0_10] : memref<48x256xbf16, #tpu.memory_space<vmem>>, vector<32x256xbf16>
    %cst_11 = arith.constant dense<0.000000e+00> : vector<32x128xf32>
    %24 = tpu.matmul %23, %22, %cst_11 {dimension_numbers = #tpu.dot_dimension_numbers<[1], [1], [0], [0], [0, 0, 1, 0], [], []>} : vector<32x256xbf16>, vector<128x256xbf16>, vector<32x128xf32> -> vector<32x128xf32>
    %25 = vector.extract_strided_slice %24 {offsets = [0, 0], sizes = [16, 128], strides = [1, 1]} : vector<32x128xf32> to vector<16x128xf32>
    %26 = vector.extract_strided_slice %24 {offsets = [16, 0], sizes = [1, 128], strides = [1, 1]} : vector<32x128xf32> to vector<1x128xf32>
    %c0_12 = arith.constant 0 : index
    %27 = memref.load %arg7[%c0_12] : memref<1xf32, #tpu.memory_space<smem>>
    %28 = tpu.reciprocal %26 {approx = true} : vector<1x128xf32> -> vector<1x128xf32>
    %29 = vector.broadcast %27 : f32 to vector<1x128xf32>
    %30 = arith.mulf %29, %28 : vector<1x128xf32>
    %31 = vector.broadcast %30 : vector<1x128xf32> to vector<16x128xf32>
    %32 = arith.mulf %25, %31 : vector<16x128xf32>
    %33 = arith.addf %32, %7 : vector<16x128xf32>
    %c0_13 = arith.constant 0 : index
    %c0_14 = arith.constant 0 : index
    %c0_15 = arith.constant 0 : index
    %34 = vector.load %arg8[%c0_13, %c0_14, %c0_15] : memref<1x16x128xf32, #tpu.memory_space<vmem>>, vector<1x16x128xf32>
    %35 = vector.shape_cast %34 : vector<1x16x128xf32> to vector<16x128xf32>
    %36 = vector.shape_cast %33 : vector<16x128xf32> to vector<1x16x128xf32>
    tpu.vector_store %arg8[%c0_13, %c0_14, %c0_15], %36 {strides = array<i32>} : memref<1x16x128xf32, #tpu.memory_space<vmem>>, vector<1x16x128xf32>,
    return
  }
  func.func @transform_0(%arg0: i32, %arg1: i32) -> (i32, i32, i32) {
    %c0_i32 = arith.constant 0 : i32
    %c0_i32_0 = arith.constant 0 : i32
    %c0_i32_1 = arith.constant 0 : i32
    return %arg0, %c0_i32, %c0_i32_0 : i32, i32, i32
  }
  func.func @transform_1(%arg0: i32, %arg1: i32) -> (i32, i32) {
    %c0_i32 = arith.constant 0 : i32
    %c0_i32_0 = arith.constant 0 : i32
    %c0_i32_1 = arith.constant 0 : i32
    return %c0_i32, %c0_i32_0 : i32, i32
  }
  func.func @transform_2(%arg0: i32, %arg1: i32) -> (i32, i32) {
    %c0_i32 = arith.constant 0 : i32
    %c0_i32_0 = arith.constant 0 : i32
    %c0_i32_1 = arith.constant 0 : i32
    return %c0_i32, %c0_i32_0 : i32, i32
  }
  func.func @transform_3(%arg0: i32, %arg1: i32) -> (i32, i32) {
    %c0_i32 = arith.constant 0 : i32
    %c0_i32_0 = arith.constant 0 : i32
    %c0_i32_1 = arith.constant 0 : i32
    return %c0_i32, %c0_i32_0 : i32, i32
  }
  func.func @transform_4(%arg0: i32, %arg1: i32) -> (i32, i32) {
    %c0_i32 = arith.constant 0 : i32
    %c0_i32_0 = arith.constant 0 : i32
    %c0_i32_1 = arith.constant 0 : i32
    return %c0_i32, %c0_i32_0 : i32, i32
  }
  func.func @transform_5(%arg0: i32, %arg1: i32) -> i32 {
    %c0_i32 = arith.constant 0 : i32
    %c0_i32_0 = arith.constant 0 : i32
    return %c0_i32 : i32
  }
  func.func @transform_6(%arg0: i32, %arg1: i32) -> (i32, i32, i32) {
    %c0_i32 = arith.constant 0 : i32
    %c0_i32_0 = arith.constant 0 : i32
    return %arg0, %c0_i32, %arg1 : i32, i32, i32
  }
}

</mosaic_0001>

<bundles_post_ra>
// kernel: tpu_custom_call.1
= control target key start
LH: loop header
LB: loop body
LE: loop exit
PB: predicated region body
PF: predicated region fallthrough
CT: control target
= control target key end

     0   :  { %s1610_s0 = inlined_call_operand.vmem [shape: f32[2,16,256], index: 0, kind: input, shape index: {}]   ;;  %s1611_s1 = inlined_call_operand.vmem [shape: bf16[16,16], index: 1, kind: input, shape index: {}]   ;;  %s1612_s2 = inlined_call_operand.vmem [shape: f32[16,1], index: 2, kind: input, shape index: {}]   ;;  %s1613_s3 = inlined_call_operand.vmem [shape: bf16[48,16], index: 3, kind: input, shape index: {}]   ;;  %s1614_s4 = inlined_call_operand.vmem [shape: f32[48,1], index: 4, kind: input, shape index: {}]   ;;  %s1615_s5 = inlined_call_operand.<no memory space> [shape: f32[1], index: 5, kind: input, shape index: {}]   ;;  %s1616_s6 = inlined_call_operand.hbm [shape: f32[2,16,256], index: 6, kind: output, shape index: {}]  }
   0x1   :  { %11 = sst [smem:[#allocation3]] %s1615_s5 }
   0x2   :  { %12 = vsyncpa [#allocation5], 0 }
   0x3   :  { %14 = vsyncpa [#allocation5 + $0x1], 0  ;;  %s1301_s23 = smov 0   ;;  %s1303_s24 = smov 0  }
   0x4   :  { %s1305_s25 = smov 0   ;;  %s1307_s26 = smov 0  }
   0x5   :  { %s1309_s27 = smov 0   ;;  %s1311_s28 = smov 0  }
   0x6   :  { %s1313_s29 = smov 0   ;;  %s1315_s30 = smov 0  }
   0x7 LB: > { %s924_s5 = sadd.s32 4294967295, %s1256_s30   ;;  %s925_s7 = sadd.s32 4294967294, %s1256_s30   ;;  %s1256_s30 = sphi %s1315_s30, %s20_s30   ;;  %s1252_s29 = sphi %s1313_s29, %s1625_s29   ;;  %s1248_s28 = sphi %s1311_s28, %s1624_s28   ;;  %s1244_s27 = sphi %s1309_s27, %s1623_s27   ;;  %s1240_s26 = sphi %s1307_s26, %s1622_s26   ;;  %s1236_s25 = sphi %s1305_s25, %s1621_s25   ;;  %s1232_s24 = sphi %s1303_s24, %s1620_s24   ;;  %s1228_s23 = sphi %s1301_s23, %s1619_s23  }
   0x8   : > { %s29_s8 = sadd.s32 1, %s1248_s28  ;;  %s32_s9 = sadd.s32 1, %s1252_s29 }
   0x9   : > { %p30_p0 = scmp.ge.s32.totalorder %s29_s8, 2  ;;  %p182_p1 = scmp.ne.s32.totalorder %s1236_s25, %s1232_s24 }
   0xa   : > { %p183_p2 = scmp.eq.s32.totalorder %s924_s5, 3  ;;  %p188_p5 = scmp.ne.s32.totalorder %s1232_s24, %s1228_s23 }
   0xb   : > { %s1627_s8 = smov (%p30_p0, %s29_s8), 0  ;;  %s1629_s9 = smov (!%p30_p0, %s32_s9), %s1252_s29 }
   0xc   : > { %s168_s10 = ssub.s32 %s1248_s28, %s1627_s8  ;;  %p1352_p3 = por %p183_p2, %p182_p1 }
   0xd   : > { %p34_p4 = scmp.ge.s32.totalorder %s1629_s9, 2  ;;  %p189_p6 = scmp.eq.s32.totalorder %s925_s7, 3 }
   0xe   : > { %p928_p7 = scmp.ge.s32.totalorder %s1256_s30, 1  ;;  %p230_p9 = scmp.lt.s32.totalorder %s1256_s30, 5 }
   0xf   : > { %s1631_s9 = smov (%p34_p4, %s1629_s9), 0  ;;  %p1361_p8 = por %p189_p6, %p188_p5 }
  0x10   : > { %s167_s13 = ssub.s32 %s1252_s29, %s1631_s9  ;;  %s172_s14 = sadd.s32 1, %s1236_s25 }
  0x11   : > { %s169_s15 = sor.u32 %s168_s10, %s167_s13  ;;  %p231_p10 = pnand %p928_p7, %p230_p9 }
  0x12   : > { %p170_p11 = scmp.eq.s32.totalorder %s169_s15, 0  ;;  %s257_s17 = sand.u32 (!%p231_p10), 1, %s1232_s24  }
  0x13   : > { %234 = sbr.rel (%p231_p10) target bundleno = 1136 (0x470), region = 44  ;;  %p260_p12 = scmp.lt.s32.totalorder (!%p231_p10), %s1244_s27, 1 }
  0x14   : > { %s1370_s16 = scalar_select %p170_p11, %s1236_s25, %s172_s14  }
  0x15   : > { %s929_s18 = sshll.u32 (!%p231_p10), %s257_s17, 4  ;;  %p932_p13 = scmp.ne.s32.totalorder (!%p231_p10), %s1240_s26, 0 }
  0x16   : > { %s1382_s7 = scalar_lea.vmem (!%p231_p10), [#allocation4], %s929_s18 }
  0x18   : > { %s261_s19 = scalar_select %p260_p12, %s1244_s27, 1 }
  0x19   : > { %269 = sbr.rel (%p932_p13) target bundleno = 198 (0xc6), region = 48 }
  0x1a   : > { %s1003_s20 = sshll.u32 %s261_s19, 5 }
  0x1b   : > { %s1380_s5 = scalar_lea.vmem %s1610_s0, %s1003_s20 }
  0x1e   : > { %v270_v0 = vld [vmem:[%s1380_s5] sm:$0xff]  ;;  %v272_v1 = vld [vmem:[%s1380_s5 + $0x10] sm:$0xff]  ;;  %v271_v2 = vld [vmem:[%s1380_s5 + $0x8] sm:$0xff]  ;;  %v1258_v5 = vmov 0   ;;  %vm333_vm0 = vcmask 130048  }
  0x1f   : > { %v274_v3 = vpack.c.bf16 %v272_v1, %v270_v0  ;;  %v273_v4 = vld [vmem:[%s1380_s5 + $0x18] sm:$0xff]  ;;  %1093 = vset.pattern.permute.xlu1 %v1258_v5  ;;  %1092 = vset.pattern.permute.xlu0 %v1258_v5  ;;  %v1005_v7 = vld [vmem:[%s1613_s3 + $0x8] sm:$0xff]  ;;  %v1004_v8 = vld [vmem:[%s1613_s3] sm:$0xff] }
  0x20   : > { %v275_v6 = vpack.c.bf16 %v273_v4, %v271_v2  ;;  %v284_v9 = vld [vmem:[%s1614_s4 + $0x10] sm:$0xff]  ;;  %1094 = vset.pattern.permute.xlu2 %v1258_v5  ;;  %v282_v10 = vld [vmem:[%s1614_s4] sm:$0xff]  ;;  %v285_v12 = vld [vmem:[%s1614_s4 + $0x18] sm:$0xff] }
  0x21   : > { %1014 = vmatpush.bf16.msra.mxu2 %v274_v3  ;;  %350 = vmatpush.bf16.msra.mxu0 %v274_v3  ;;  %v286_v11 = vld [vmem:[%s1614_s4 + $0x20] sm:$0xff]  ;;  %v283_v13 = vld [vmem:[%s1614_s4 + $0x8] sm:$0xff]  ;;  %v1006_v15 = vld [vmem:[%s1613_s3 + $0x10] sm:$0xff] }
  0x22   : > { %1015 = vmatpush.bf16.msra.mxu3 %v275_v6  ;;  %374 = vmatpush.bf16.msra.mxu1 %v275_v6  ;;  %v287_v14 = vld [vmem:[%s1614_s4 + $0x28] sm:$0xff] }
  0x23   : > { %300 = vperm.xlu1 %1093, %v284_v9   ;;  %290 = vperm.xlu0 %1092, %v282_v10  }
  0x24   : > { %946 = vmatmul.msk.bf16.vlgmr.msra.gmra.mxu2 %vm333_vm0, %v1005_v7  ;;  %945 = vmatmul.msk.bf16.vlgmr.msra.gmra.mxu0 %vm333_vm0, %v1004_v8 }
  0x25   : > { %949 = vmatmul.msk.bf16.vlgmr.msra.gmra.mxu3 %vm333_vm0, %v1005_v7  ;;  %948 = vmatmul.msk.bf16.vlgmr.msra.gmra.mxu1 %vm333_vm0, %v1004_v8 }
  0x26   : > { %310 = vperm.xlu2 %1094, %v286_v11  }
  0x2b   : > { %305 = vperm.xlu1 %1093, %v285_v12   ;;  %295 = vperm.xlu0 %1092, %v283_v13  }
  0x2e   : > { %315 = vperm.xlu2 %1094, %v287_v14  }
  0x34   : > { %947 = vmatmul.msk.bf16.gmra.mxu2 %vm333_vm0, %v1006_v15 }
  0x35   : > { %950 = vmatmul.msk.bf16.gmra.mxu3 %vm333_vm0, %v1006_v15 }
  0x80   : > { %v311_v40 = vpop.permute.xlu2 %310 }
  0x88   : > { %v316_v46 = vpop.permute.xlu2 %315 }
  0x95   : > { %v291_v16 = vpop.permute.xlu0 %290  ;;  %v301_v20 = vpop.permute.xlu1 %300 }
  0x9d   : > { %v296_v24 = vpop.permute.xlu0 %295  ;;  %v306_v33 = vpop.permute.xlu1 %305 }
  0xa1   : > { %v352_v17 = vpop.f32.mrf.mxu0 }
  0xa2   : > { %v353_v18 = vadd.f32 %v352_v17, %v291_v16  ;;  %v376_v19 = vpop.f32.mrf.mxu1 }
  0xa3   : > { %v377_v21 = vadd.f32 %v376_v19, %v291_v16 }
  0xa5   : > { %v391_v22 = vpack.c.bf16 %v377_v21, %v353_v18 }
  0xa7   : > { %v357_v23 = vpop.f32.mrf.mxu2  ;;  %397 = vst [vmem:[#allocation2] sm:$0xff] %v391_v22 }
  0xa8   : > { %v358_v25 = vadd.f32 %v357_v23, %v301_v20  ;;  %v381_v26 = vpop.f32.mrf.mxu3 }
  0xa9   : > { %v382_v27 = vadd.f32 %v381_v26, %v301_v20  ;;  %v354_v28 = vpop.f32.mrf.mxu0 }
  0xaa   : > { %v355_v29 = vadd.f32 %v354_v28, %v296_v24  ;;  %v378_v30 = vpop.f32.mrf.mxu1 }
  0xab   : > { %v393_v31 = vpack.c.bf16 %v382_v27, %v358_v25  ;;  %v379_v32 = vadd.f32 %v378_v30, %v296_v24 }
  0xad   : > { %399 = vst [vmem:[#allocation2 + $0x10] sm:$0xff] %v393_v31  ;;  %v392_v34 = vpack.c.bf16 %v379_v32, %v355_v29 }
  0xaf   : > { %v359_v35 = vpop.f32.mrf.mxu2  ;;  %398 = vst [vmem:[#allocation2 + $0x8] sm:$0xff] %v392_v34 }
  0xb0   : > { %v360_v36 = vadd.f32 %v359_v35, %v306_v33  ;;  %v383_v37 = vpop.f32.mrf.mxu3 }
  0xb1   : > { %v384_v38 = vadd.f32 %v383_v37, %v306_v33 }
  0xb3   : > { %v394_v39 = vpack.c.bf16 %v384_v38, %v360_v36 }
  0xb5   : > { %400 = vst [vmem:[#allocation2 + $0x18] sm:$0xff] %v394_v39 }
  0xb7   : > { %v362_v41 = vpop.f32.mrf.mxu2 }
  0xb8   : > { %v363_v42 = vadd.f32 %v362_v41, %v311_v40  ;;  %v386_v43 = vpop.f32.mrf.mxu3 }
  0xb9   : > { %v387_v44 = vadd.f32 %v386_v43, %v311_v40 }
  0xbb   : > { %v395_v45 = vpack.c.bf16 %v387_v44, %v363_v42 }
  0xbd   : > { %401 = vst [vmem:[#allocation2 + $0x20] sm:$0xff] %v395_v45 }
  0xbf   : > { %v364_v47 = vpop.f32.mrf.mxu2 }
  0xc0   : > { %v365_v48 = vadd.f32 %v364_v47, %v316_v46  ;;  %v388_v49 = vpop.f32.mrf.mxu3 }
  0xc1   : > { %v389_v50 = vadd.f32 %v388_v49, %v316_v46 }
  0xc3   : > { %v396_v51 = vpack.c.bf16 %v389_v50, %v365_v48 }
  0xc5   : > { %402 = vst [vmem:[#allocation2 + $0x28] sm:$0xff] %v396_v51 }
  0xc6 PF: > { %s951_s10 = sshll.u32 %s1240_s26, 7  ;;  %v413_v52 = vld [vmem:[%s1612_s2] sm:$0xff]  ;;  %v1259_v53 = vmov 0   ;;  %vm430_vm1 = vcmask 130048   ;;  %v414_v58 = vld [vmem:[%s1612_s2 + $0x8] sm:$0xff]  ;;  %s999_s13 = sshll.u32 %s1244_s27, 2 }
  0xc7   : > { %s404_s15 = sshra.s32 %s951_s10, 7  ;;  %1095 = vset.pattern.permute.xlu0 %v1259_v53  ;;  %v1007_v57 = vld [vmem:[%s1611_s1] sm:$0xff]  ;;  %v1009_v60 = vld [vmem:[#allocation2 + $0x4] sm:$0xf0]  ;;  %v962_v63 = vld [vmem:[#allocation2 + $0x8] sm:$0xf0]  ;;  %s841_s14 = sadd.s32 %s1240_s26, %s999_s13 }
  0xc8   : > { %s952_s18 = sshll.u32 %s404_s15, 3  ;;  %417 = vperm.xlu0 %1095, %v413_v52   ;;  %v960_v59 = vld [vmem:[#allocation2] sm:$0xf]  ;;  %v1008_v61 = vld [vmem:[#allocation2 + $0x4] sm:$0xf]  ;;  %s1000_s15 = sshll.u32 %s841_s14, 3 }
  0xc9   : > { %s407_s19 = scalar_lea.vmem %s1380_s5, %s952_s18  ;;  %v961_v62 = vor.u32 %v1009_v60, %v960_v59  ;;  %v965_v0 = vor.u32 %v1008_v61, %v962_v63  ;;  %s819_s5 = sld [smem:[#allocation3]] }
  0xca   : > { %v1427_v54 = vld [vmem:[%s407_s19] sm:$0xff]  ;;  %v1429_v55 = vld [vmem:[%s407_s19 + $0x10] sm:$0xff]  ;;  %s843_s20 = scalar_lea.hbm %s1616_s6, %s1000_s15  ;;  %s844_s27 = sshll.u32 %s1382_s7, 4  ;;  %s845_s27 = int_to_ptr.vmem [resolvable:$true] %s844_s27 }
  0xcb   : > { %v412_v56 = vpack.c.bf16 %v1429_v55, %v1427_v54  ;;  %508 = vmatpush.bf16.msra.mxu1 %v961_v62  ;;  %557 = vmatpush.bf16.msra.mxu2 %v965_v0  ;;  %s846_s21 = sshll.u32 %s843_s20, 4  ;;  %s831_s26 = scalar_lea.sflag [#allocation5], %s257_s17  ;;  %s847_s21 = int_to_ptr.hbm [resolvable:$true] %s846_s21 }
  0xcc   : > { %s1176_s22 = sshra.s32 %s847_s21, 4  ;;  %s1182_s14 = scalar_lea.hbm %s1616_s6, 64  ;;  %s1177_s22 = int_to_ptr.hbm [resolvable:$true] %s1176_s22 }
  0xcd   : > { %441 = vmatpush.bf16.msra.mxu0 %v412_v56  ;;  %s1178_s10 = scalar_lea.hbm %s1177_s22, 16  ;;  %p1183_p4 = scmp.lt.s32.totalorder %s1177_s22, %s1616_s6 }
  0xce   : > { %p1179_p0 = scmp.ne.s32.totalorder %s1177_s22, %s1178_s10  ;;  %p1184_p5 = scmp.lt.s32.totalorder %s1182_s14, %s1178_s10 }
  0xd0   : > { %957 = vmatmul.msk.bf16.vlgmr.msra.gmra.mxu0 %vm430_vm1, %v1007_v57  ;;  %422 = vperm.xlu0 %1095, %v414_v58   ;;  %p1180_p1 = pnand %p1179_p0, %p1352_p3  ;;  %p1185_p6 = por %p1184_p5, %p1183_p4 }
  0xd2   : > { %p1181_p2 = pneg %p1180_p1 }
  0xd4   : > { %p1186_p7 = pnand %p1185_p6, %p1181_p2 }
 0x13a   : > { %v418_v1 = vpop.permute.xlu0 %417 }
 0x142   : > { %v423_v3 = vpop.permute.xlu0 %422 }
 0x14d   : > { %v443_v2 = vpop.f32.mrf.mxu0 }
 0x14e   : > { %v444_v5 = vadd.f32 %v443_v2, %v418_v1 }
 0x155   : > { %v445_v4 = vpop.f32.mrf.mxu0 }
 0x156   : > { %v446_v6 = vadd.f32 %v445_v4, %v423_v3 }
 0x158   : > { %v450_v7 = vpack.c.bf16 %v446_v6, %v444_v5 }
 0x15a   : > { %451 = vxpose.xlu1.c.b16.start.end [1/1] (short) %v450_v7, 128 }
 0x206   : > { %v459_v8 = vpop.trf.xlu1 }
 0x207   : > { %966 = vmatmul.msk.bf16.vlgmr.msra.gmra.mxu1 %vm430_vm1, %v459_v8  ;;  %974 = vmatmul.msk.bf16.vlgmr.msra.gmra.mxu2 %vm430_vm1, %v459_v8 }
 0x216   : > { %v460_v9 = vpop.trf.xlu1 }
 0x217   : > { %967 = vmatmul.msk.bf16.gmra.mxu1 %vm430_vm1, %v460_v9  ;;  %975 = vmatmul.msk.bf16.gmra.mxu2 %vm430_vm1, %v460_v9 }
 0x226   : > { %v461_v10 = vpop.trf.xlu1 }
 0x227   : > { %968 = vmatmul.msk.bf16.gmra.mxu1 %vm430_vm1, %v461_v10  ;;  %976 = vmatmul.msk.bf16.gmra.mxu2 %vm430_vm1, %v461_v10 }
 0x236   : > { %v462_v11 = vpop.trf.xlu1 }
 0x237   : > { %969 = vmatmul.msk.bf16.gmra.mxu1 %vm430_vm1, %v462_v11  ;;  %977 = vmatmul.msk.bf16.gmra.mxu2 %vm430_vm1, %v462_v11 }
 0x246   : > { %v463_v12 = vpop.trf.xlu1 }
 0x247   : > { %970 = vmatmul.msk.bf16.gmra.mxu1 %vm430_vm1, %v463_v12  ;;  %978 = vmatmul.msk.bf16.gmra.mxu2 %vm430_vm1, %v463_v12 }
 0x256   : > { %v464_v13 = vpop.trf.xlu1 }
 0x257   : > { %971 = vmatmul.msk.bf16.gmra.mxu1 %vm430_vm1, %v464_v13  ;;  %979 = vmatmul.msk.bf16.gmra.mxu2 %vm430_vm1, %v464_v13 }
 0x266   : > { %v465_v14 = vpop.trf.xlu1 }
 0x267   : > { %972 = vmatmul.msk.bf16.gmra.mxu1 %vm430_vm1, %v465_v14  ;;  %980 = vmatmul.msk.bf16.gmra.mxu2 %vm430_vm1, %v465_v14 }
 0x276   : > { %v466_v15 = vpop.trf.xlu1 }
 0x277   : > { %973 = vmatmul.msk.bf16.gmra.mxu1 %vm430_vm1, %v466_v15  ;;  %981 = vmatmul.msk.bf16.gmra.mxu2 %vm430_vm1, %v466_v15 }
 0x284   : > { %v1456_v16 = vpop.f32.mrf.mxu1 }
 0x28a   : > { %v1458_v17 = vpop.f32.mrf.mxu2 }
 0x28b   : > { %v599_v58 = vmax.f32 %v1456_v16, %v1458_v17 }
 0x28c   : > { %v1460_v18 = vpop.f32.mrf.mxu1 }
 0x292   : > { %v1462_v19 = vpop.f32.mrf.mxu2 }
 0x293   : > { %v602_v1 = vmax.f32 %v1460_v18, %v1462_v19 }
 0x294   : > { %v1464_v20 = vpop.f32.mrf.mxu1 }
 0x29a   : > { %v1466_v21 = vpop.f32.mrf.mxu2 }
 0x29b   : > { %v605_v57 = vmax.f32 %v1464_v20, %v1466_v21 }
 0x29c   : > { %v1468_v22 = vpop.f32.mrf.mxu1 }
 0x2a2   : > { %v1470_v23 = vpop.f32.mrf.mxu2 }
 0x2a3   : > { %v608_v0 = vmax.f32 %v1468_v22, %v1470_v23 }
 0x2a4   : > { %v1472_v24 = vpop.f32.mrf.mxu1 }
 0x2aa   : > { %v1474_v25 = vpop.f32.mrf.mxu2 }
 0x2ab   : > { %v611_v50 = vmax.f32 %v1472_v24, %v1474_v25 }
 0x2ac   : > { %v1476_v26 = vpop.f32.mrf.mxu1 }
 0x2b2   : > { %v1478_v27 = vpop.f32.mrf.mxu2 }
 0x2b3   : > { %v614_v63 = vmax.f32 %v1476_v26, %v1478_v27 }
 0x2b4   : > { %v1480_v28 = vpop.f32.mrf.mxu1 }
 0x2ba   : > { %v1482_v29 = vpop.f32.mrf.mxu2 }
 0x2bb   : > { %v617_v61 = vmax.f32 %v1480_v28, %v1482_v29 }
 0x2bc   : > { %v1484_v30 = vpop.f32.mrf.mxu1 }
 0x2c2   : > { %v1486_v31 = vpop.f32.mrf.mxu2 }
 0x2c3   : > { %v620_v62 = vmax.f32 %v1484_v30, %v1486_v31 }
 0x2c4   : > { %v1488_v32 = vpop.f32.mrf.mxu1 }
 0x2ca   : > { %v1490_v33 = vpop.f32.mrf.mxu2 }
 0x2cb   : > { %v623_v59 = vmax.f32 %v1488_v32, %v1490_v33 }
 0x2cc   : > { %v1492_v34 = vpop.f32.mrf.mxu1 }
 0x2d2   : > { %v1494_v35 = vpop.f32.mrf.mxu2 }
 0x2d3   : > { %v626_v60 = vmax.f32 %v1492_v34, %v1494_v35 }
 0x2d4   : > { %v1496_v36 = vpop.f32.mrf.mxu1 }
 0x2da   : > { %v1498_v37 = vpop.f32.mrf.mxu2 }
 0x2db   : > { %v629_v45 = vmax.f32 %v1496_v36, %v1498_v37 }
 0x2dc   : > { %v1500_v38 = vpop.f32.mrf.mxu1 }
 0x2e2   : > { %v1502_v39 = vpop.f32.mrf.mxu2 }
 0x2e3   : > { %v632_v49 = vmax.f32 %v1500_v38, %v1502_v39 }
 0x2e4   : > { %v1504_v40 = vpop.f32.mrf.mxu1 }
 0x2ea   : > { %v1506_v41 = vpop.f32.mrf.mxu2 }
 0x2eb   : > { %v635_v42 = vmax.f32 %v1504_v40, %v1506_v41 }
 0x2ec   : > { %v542_v43 = vpop.f32.mrf.mxu1 }
 0x2ed   : > { %636 = vmax.xlane.f32.xlu2 %v635_v42 }
 0x2f2   : > { %v591_v44 = vpop.f32.mrf.mxu2 }
 0x2f3   : > { %v638_v46 = vmax.f32 %v542_v43, %v591_v44 }
 0x2f4   : > { %v545_v47 = vpop.f32.mrf.mxu1 }
 0x2f5   : > { %630 = vmax.xlane.f32.xlu2 %v629_v45  ;;  %639 = vmax.xlane.f32.xlu0 %v638_v46 }
 0x2fa   : > { %v594_v48 = vpop.f32.mrf.mxu2 }
 0x2fb   : > { %v641_v51 = vmax.f32 %v545_v47, %v594_v48 }
 0x2fc   : > { %v547_v52 = vpop.f32.mrf.mxu1 }
 0x2fd   : > { %633 = vmax.xlane.f32.xlu2 %v632_v49  ;;  %612 = vmax.xlane.f32.xlu0 %v611_v50 }
 0x2fe   : > { %642 = vmax.xlane.f32.xlu1 %v641_v51 }
 0x302   : > { %v596_v53 = vpop.f32.mrf.mxu2 }
 0x303   : > { %v644_v56 = vmax.f32 %v547_v52, %v596_v53 }
 0x305   : > { %606 = vmax.xlane.f32.xlu0 %v605_v57  ;;  %645 = vmax.xlane.f32.xlu2 %v644_v56 }
 0x30d   : > { %600 = vmax.xlane.f32.xlu0 %v599_v58  ;;  %624 = vmax.xlane.f32.xlu2 %v623_v59 }
 0x315   : > { %627 = vmax.xlane.f32.xlu2 %v626_v60 }
 0x31d   : > { %618 = vmax.xlane.f32.xlu2 %v617_v61 }
 0x325   : > { %621 = vmax.xlane.f32.xlu2 %v620_v62 }
 0x32d   : > { %615 = vmax.xlane.f32.xlu2 %v614_v63 }
 0x335   : > { %609 = vmax.xlane.f32.xlu2 %v608_v0 }
 0x33d   : > { %603 = vmax.xlane.f32.xlu2 %v602_v1 }
 0x360   : > { %v637_v2 = vpop.xlane.xlu2 %636 }
 0x361   : > { %v671_v46 = vsub.f32 %v1504_v40, %v637_v2  ;;  %v672_v49 = vsub.f32 %v1506_v41, %v637_v2 }
 0x363   : > { %v729_v57 = vmul.f32 1.442695, %v672_v49 }
 0x368   : > { %v631_v3 = vpop.xlane.xlu2 %630  ;;  %v640_v11 = vpop.xlane.xlu0 %639 }
 0x369   : > { %v673_v42 = vsub.f32 %v542_v43, %v640_v11  ;;  %v674_v45 = vsub.f32 %v591_v44, %v640_v11  ;;  %v667_v41 = vsub.f32 %v1496_v36, %v631_v3  ;;  %v668_v60 = vsub.f32 %v1498_v37, %v631_v3 }
 0x36b   : > { %v733_v50 = vmul.f32 1.442695, %v674_v45  ;;  %v719_v1 = vmul.f32 1.442695, %v667_v41  ;;  %v721_v2 = vmul.f32 1.442695, %v668_v60 }
 0x370   : > { %v634_v4 = vpop.xlane.xlu2 %633 }
 0x371   : > { %v643_v5 = vpop.xlane.xlu1 %642  ;;  %v669_v43 = vsub.f32 %v1500_v38, %v634_v4  ;;  %v670_v44 = vsub.f32 %v1502_v39, %v634_v4 }
 0x372   : > { %v675_v6 = vsub.f32 %v545_v47, %v643_v5  ;;  %v676_v7 = vsub.f32 %v594_v48, %v643_v5  ;;  %v731_v48 = vmul.f32 1.442695, %v673_v42 }
 0x373   : > { %v723_v62 = vmul.f32 1.442695, %v669_v43  ;;  %v725_v63 = vmul.f32 1.442695, %v670_v44 }
 0x374   : > { %v735_v9 = vmul.f32 1.442695, %v675_v6  ;;  %v737_v12 = vmul.f32 1.442695, %v676_v7 }
 0x376   : > { %1096 = vpow2.f32 %v735_v9 }
 0x377   : > { %1098 = vpow2.f32 %v737_v12 }
 0x378   : > { %v646_v8 = vpop.xlane.xlu2 %645 }
 0x379   : > { %v677_v10 = vsub.f32 %v547_v52, %v646_v8  ;;  %v678_v13 = vsub.f32 %v596_v53, %v646_v8  ;;  %v727_v52 = vmul.f32 1.442695, %v671_v46 }
 0x37b   : > { %v739_v14 = vmul.f32 1.442695, %v677_v10  ;;  %v741_v15 = vmul.f32 1.442695, %v678_v13 }
 0x37c   : > { %v1097_v51 = vpop.eup %1096 }
 0x37d   : > { %1100 = vpow2.f32 %v739_v14  ;;  %v1099_v56 = vpop.eup %1098  ;;  %v613_v14 = vpop.xlane.xlu0 %612 }
 0x37e   : > { %1102 = vpow2.f32 %v741_v15 }
 0x37f   : > { %1104 = vpow2.f32 %v731_v48 }
 0x380   : > { %v625_v47 = vpop.xlane.xlu2 %624  ;;  %1106 = vpow2.f32 %v733_v50 }
 0x381   : > { %1108 = vpow2.f32 %v727_v52  ;;  %v663_v37 = vsub.f32 %v1488_v32, %v625_v47  ;;  %v664_v7 = vsub.f32 %v1490_v33, %v625_v47 }
 0x382   : > { %1110 = vpow2.f32 %v729_v57  ;;  %v656_v57 = vsub.f32 %v1474_v25, %v613_v14 }
 0x383   : > { %v1101_v53 = vpop.eup %1100  ;;  %1112 = vpow2.f32 %v723_v62  ;;  %v711_v12 = vmul.f32 1.442695, %v663_v37 }
 0x384   : > { %v1103_v58 = vpop.eup %1102  ;;  %v757_v40 = vpack.c.bf16 %v1101_v53, %v1097_v51  ;;  %1114 = vpow2.f32 %v725_v63  ;;  %v697_v41 = vmul.f32 1.442695, %v656_v57  ;;  %v992_v57 = vld [vmem:[#allocation2 + $0x20] sm:$0xf] }
 0x385   : > { %v758_v59 = vpack.c.bf16 %v1103_v58, %v1099_v56  ;;  %v1105_v0 = vpop.eup %1104  ;;  %1116 = vpow2.f32 %v719_v1  ;;  %v607_v58 = vpop.xlane.xlu0 %606 }
 0x386   : > { %783 = vmatpush.bf16.xpose.msra.mxu3 %v757_v40  ;;  %v1107_v38 = vpop.eup %1106  ;;  %1118 = vpow2.f32 %v721_v2  ;;  %v651_v62 = vsub.f32 %v1464_v20, %v607_v58 }
 0x387   : > { %801 = vmatpush.bf16.xpose.msrb.mxu0 %v758_v59  ;;  %v1109_v5 = vpop.eup %1108 }
 0x388   : > { %v628_v61 = vpop.xlane.xlu2 %627  ;;  %v1111_v4 = vpop.eup %1110  ;;  %v755_v6 = vpack.c.bf16 %v1105_v0, %v1109_v5 }
 0x389   : > { %v665_v39 = vsub.f32 %v1492_v34, %v628_v61  ;;  %v666_v36 = vsub.f32 %v1494_v35, %v628_v61  ;;  %v756_v3 = vpack.c.bf16 %v1107_v38, %v1111_v4  ;;  %v1113_v11 = vpop.eup %1112  ;;  %v713_v35 = vmul.f32 1.442695, %v664_v7 }
 0x38a   : > { %v1115_v13 = vpop.eup %1114  ;;  %v652_v38 = vsub.f32 %v1466_v21, %v607_v58  ;;  %v994_v58 = vld [vmem:[#allocation2 + $0x28] sm:$0xf0] }
 0x38b   : > { %v715_v9 = vmul.f32 1.442695, %v665_v39  ;;  %v717_v10 = vmul.f32 1.442695, %v666_v36  ;;  %v1117_v42 = vpop.eup %1116  ;;  %v687_v39 = vmul.f32 1.442695, %v651_v62  ;;  %v821_v62 = vstv %s819_s5 }
 0x38c   : > { %v1119_v32 = vpop.eup %1118  ;;  %v753_v45 = vpack.c.bf16 %v1113_v11, %v1117_v42  ;;  %v689_v4 = vmul.f32 1.442695, %v652_v38 }
 0x38d   : > { %1120 = vpow2.f32 %v715_v9  ;;  %v754_v46 = vpack.c.bf16 %v1115_v13, %v1119_v32 }
 0x38e   : > { %784 = vmatpush.bf16.xpose.msra.mxu3 %v755_v6  ;;  %1122 = vpow2.f32 %v717_v10 }
 0x38f   : > { %802 = vmatpush.bf16.xpose.msrb.mxu0 %v756_v3  ;;  %1124 = vpow2.f32 %v711_v12 }
 0x390   : > { %v619_v8 = vpop.xlane.xlu2 %618  ;;  %1126 = vpow2.f32 %v713_v35 }
 0x391   : > { %v659_v34 = vsub.f32 %v1480_v28, %v619_v8  ;;  %v660_v15 = vsub.f32 %v1482_v29, %v619_v8  ;;  %v655_v29 = vsub.f32 %v1472_v24, %v613_v14 }
 0x393   : > { %v703_v33 = vmul.f32 1.442695, %v659_v34  ;;  %v705_v49 = vmul.f32 1.442695, %v660_v15  ;;  %v1121_v50 = vpop.eup %1120  ;;  %v695_v40 = vmul.f32 1.442695, %v655_v29 }
 0x394   : > { %v1123_v56 = vpop.eup %1122  ;;  %v1010_v29 = vld [vmem:[#allocation2 + $0x14] sm:$0xf] }
 0x395   : > { %1128 = vpow2.f32 %v703_v33  ;;  %v1125_v53 = vpop.eup %1124 }
 0x396   : > { %785 = vmatpush.bf16.xpose.msra.mxu3 %v753_v45  ;;  %1130 = vpow2.f32 %v705_v49  ;;  %v1127_v43 = vpop.eup %1126  ;;  %v751_v44 = vpack.c.bf16 %v1121_v50, %v1125_v53  ;;  %v1011_v50 = vld [vmem:[#allocation2 + $0x14] sm:$0xf0]  ;;  %v1013_v53 = vld [vmem:[#allocation2 + $0x24] sm:$0xf0] }
 0x397   : > { %803 = vmatpush.bf16.xpose.msrb.mxu0 %v754_v46 }
 0x398   : > { %v622_v47 = vpop.xlane.xlu2 %621 }
 0x399   : > { %v661_v28 = vsub.f32 %v1484_v30, %v622_v47  ;;  %v662_v48 = vsub.f32 %v1486_v31, %v622_v47  ;;  %v752_v30 = vpack.c.bf16 %v1123_v56, %v1127_v43  ;;  %v1012_v43 = vld [vmem:[#allocation2 + $0x24] sm:$0xf] }
 0x39b   : > { %v707_v51 = vmul.f32 1.442695, %v661_v28  ;;  %v709_v52 = vmul.f32 1.442695, %v662_v48  ;;  %v1129_v59 = vpop.eup %1128 }
 0x39c   : > { %v1131_v61 = vpop.eup %1130 }
 0x39d   : > { %1132 = vpow2.f32 %v707_v51  ;;  %v986_v51 = vld [vmem:[#allocation2 + $0x18] sm:$0xf0] }
 0x39e   : > { %1134 = vpow2.f32 %v709_v52  ;;  %786 = vmatpush.bf16.xpose.msra.mxu3 %v751_v44  ;;  %v989_v56 = vor.u32 %v1010_v29, %v986_v51  ;;  %v993_v44 = vor.u32 %v1013_v53, %v992_v57 }
 0x39f   : > { %804 = vmatpush.bf16.xpose.msrb.mxu0 %v752_v30  ;;  %1136 = vpow2.f32 %v695_v40  ;;  %v997_v40 = vor.u32 %v1012_v43, %v994_v58 }
 0x3a0   : > { %v616_v31 = vpop.xlane.xlu2 %615  ;;  %1138 = vpow2.f32 %v697_v41 }
 0x3a1   : > { %v657_v24 = vsub.f32 %v1476_v26, %v616_v31  ;;  %v658_v60 = vsub.f32 %v1478_v27, %v616_v31  ;;  %v601_v26 = vpop.xlane.xlu0 %600 }
 0x3a2   : > { %v647_v21 = vsub.f32 %v1456_v16, %v601_v26  ;;  %v648_v10 = vsub.f32 %v1458_v17, %v601_v26 }
 0x3a3   : > { %v1133_v25 = vpop.eup %1132  ;;  %v699_v63 = vmul.f32 1.442695, %v657_v24  ;;  %v701_v0 = vmul.f32 1.442695, %v658_v60 }
 0x3a4   : > { %v1135_v1 = vpop.eup %1134  ;;  %v749_v2 = vpack.c.bf16 %v1133_v25, %v1129_v59  ;;  %v679_v34 = vmul.f32 1.442695, %v647_v21  ;;  %v681_v13 = vmul.f32 1.442695, %v648_v10 }
 0x3a5   : > { %1140 = vpow2.f32 %v699_v63  ;;  %v750_v5 = vpack.c.bf16 %v1135_v1, %v1131_v61  ;;  %v1137_v36 = vpop.eup %1136 }
 0x3a6   : > { %1142 = vpow2.f32 %v701_v0  ;;  %787 = vmatpush.bf16.xpose.msra.mxu3 %v749_v2  ;;  %v1139_v37 = vpop.eup %1138 }
 0x3a7   : > { %805 = vmatpush.bf16.xpose.msrb.mxu0 %v750_v5  ;;  %1144 = vpow2.f32 %v687_v39 }
 0x3a8   : > { %v610_v27 = vpop.xlane.xlu2 %609  ;;  %1146 = vpow2.f32 %v689_v4 }
 0x3a9   : > { %v653_v6 = vsub.f32 %v1468_v22, %v610_v27  ;;  %v654_v20 = vsub.f32 %v1470_v23, %v610_v27 }
 0x3ab   : > { %v1141_v3 = vpop.eup %1140  ;;  %v691_v7 = vmul.f32 1.442695, %v653_v6  ;;  %v693_v8 = vmul.f32 1.442695, %v654_v20 }
 0x3ac   : > { %v1143_v9 = vpop.eup %1142  ;;  %v747_v11 = vpack.c.bf16 %v1141_v3, %v1137_v36 }
 0x3ad   : > { %1148 = vpow2.f32 %v691_v7  ;;  %v748_v12 = vpack.c.bf16 %v1143_v9, %v1139_v37  ;;  %v1145_v23 = vpop.eup %1144 }
 0x3ae   : > { %1150 = vpow2.f32 %v693_v8  ;;  %788 = vmatpush.bf16.xpose.msra.mxu3 %v747_v11  ;;  %v1147_v35 = vpop.eup %1146 }
 0x3af   : > { %806 = vmatpush.bf16.xpose.msrb.mxu0 %v748_v12  ;;  %1152 = vpow2.f32 %v679_v34 }
 0x3b0   : > { %v604_v22 = vpop.xlane.xlu2 %603  ;;  %1154 = vpow2.f32 %v681_v13 }
 0x3b1   : > { %v649_v14 = vsub.f32 %v1460_v18, %v604_v22  ;;  %v650_v16 = vsub.f32 %v1462_v19, %v604_v22  ;;  %v984_v19 = vld [vmem:[#allocation2 + $0x10] sm:$0xf] }
 0x3b2   : > { %v985_v52 = vor.u32 %v1011_v50, %v984_v19 }
 0x3b3   : > { %v1149_v15 = vpop.eup %1148  ;;  %v683_v42 = vmul.f32 1.442695, %v649_v14  ;;  %v685_v32 = vmul.f32 1.442695, %v650_v16 }
 0x3b4   : > { %v1151_v17 = vpop.eup %1150  ;;  %v745_v45 = vpack.c.bf16 %v1149_v15, %v1145_v23 }
 0x3b5   : > { %1156 = vpow2.f32 %v683_v42  ;;  %v746_v33 = vpack.c.bf16 %v1151_v17, %v1147_v35  ;;  %v1153_v46 = vpop.eup %1152 }
 0x3b6   : > { %1158 = vpow2.f32 %v685_v32  ;;  %789 = vmatpush.bf16.xpose.msra.mxu3 %v745_v45  ;;  %v1155_v49 = vpop.eup %1154 }
 0x3b7   : > { %807 = vmatpush.bf16.xpose.msrb.mxu0 %v746_v33 }
 0x3bb   : > { %v1157_v47 = vpop.eup %1156 }
 0x3bc   : > { %v1159_v28 = vpop.eup %1158  ;;  %v743_v18 = vpack.c.bf16 %v1157_v47, %v1153_v46 }
 0x3bd   : > { %v744_v48 = vpack.c.bf16 %v1159_v28, %v1155_v49 }
 0x3be   : > { %790 = vmatpush.bf16.xpose.msra.mxu3 %v743_v18 }
 0x3bf   : > { %808 = vmatpush.bf16.xpose.msrb.mxu0 %v744_v48 }
 0x3c5   : > { %791 = vmatmul.bf16.vlgmr.msra.gmra.mxu3 %v985_v52 }
 0x3c6   : > { %809 = vmatmul.bf16.vlgmr.msrb.gmra.mxu0 %v989_v56 }
 0x3d5   : > { %796 = vmatmul.bf16.gmra.mxu3 %v993_v44 }
 0x3d6   : > { %814 = vmatmul.bf16.gmra.mxu0 %v997_v40 }
 0x443   : > { %v810_v30 = vpop.f32.mrf.mxu0 }
 0x448   : > { %v792_v41 = vpop.f32.mrf.mxu3 }
 0x449   : > { %v811_v38 = vadd.f32 %v810_v30, %v792_v41 }
 0x44b   : > { %v812_v31 = vpop.f32.mrf.mxu0 }
 0x450   : > { %v794_v59 = vpop.f32.mrf.mxu3 }
 0x451   : > { %v813_v2 = vadd.f32 %v812_v31, %v794_v59 }
 0x453   : > { %v815_v24 = vpop.f32.mrf.mxu0 }
 0x458   : > { %v797_v60 = vpop.f32.mrf.mxu3 }
 0x459   : > { %v816_v61 = vadd.f32 %v815_v24, %v797_v60 }
 0x45b   : > { %1160 = vrcp.f32 %v816_v61  ;;  %v817_v25 = vpop.f32.mrf.mxu0 }
 0x460   : > { %v799_v63 = vpop.f32.mrf.mxu3 }
 0x461   : > { %v1161_v0 = vpop.eup %1160 }
 0x462   : > { %v822_v1 = vmul.f32 %v1161_v0, %v821_v62 }
 0x464   : > { %v823_v5 = vperm.slane %v822_v1, 0 }
 0x466   : > { %v824_v39 = vmul.f32 %v823_v5, %v811_v38  ;;  %v825_v4 = vmul.f32 %v823_v5, %v813_v2 }
 0x468   : > { %v826_v26 = vadd.f32 %v824_v39, %v1427_v54  ;;  %v827_v27 = vadd.f32 %v825_v4, %v1429_v55 }
 0x46a   : > { %828 = vst [vmem:[%s1382_s7] sm:$0xff] %v826_v26 }
 0x46b   : > { %829 = vst [vmem:[%s1382_s7 + $0x8] sm:$0xff] %v827_v27 }
 0x46c   : > { %1189 = shalt.err (!%p1186_p7)
}
 0x46d   : > { %s1260_s17 = smov 128   ;;  %s1261_s7 = smov 256  }
 0x46e   : > { %s1262_s19 = smov 8  }
 0x46f   : > { %1016 = dma.vmem_to_hbm [thread:$0]  (%p1352_p3), %s845_s27, 256, %s847_s21, %s831_s26, %s1260_s17, %s1261_s7, %s1262_s19  }
 0x470 PF: > { %p1022_p9 = scmp.ge.s32.totalorder %s1256_s30, 2  ;;  %s861_s20 = sand.u32 1, %s1228_s23  }
 0x471   : > { %s862_s22 = scalar_lea.sflag [#allocation5], %s861_s20 }
 0x472   : > { %p1019_p10 = pnand %p1022_p9, %p1361_p8 }
 0x474   : > { %p1020_p11 = pneg %p1019_p10 }
 0x476   : > { %1223 = dma.done.wait (%p1020_p11), %s862_s22, 256  }
 0x477   : > { %1225 = vsyncadd (%p1020_p11), %s862_s22, 4294967040  ;;  %s20_s30 = sadd.s32 1, %s1256_s30   ;;  %s1619_s23 = smov %s1232_s24 }
 0x478   : > { %p17_p12 = scmp.ge.s32.totalorder %s20_s30, 6   ;;  %s1620_s24 = smov %s1236_s25 }
 0x479   : > { %s1621_s25 = smov %s1370_s16  ;;  %s1622_s26 = smov %s1248_s28 }
 0x47a   : > { %s1623_s27 = smov %s1252_s29  ;;  %s1624_s28 = smov %s1627_s8 }
 0x47b   : > { %s1625_s29 = smov %s1631_s9  ;;  %19 = sbr.rel (!%p17_p12) target bundleno = 7 (0x7), region = 84 }
 0x480   :  { %868 = vsyncpa [#allocation5], 1 }
 0x481   :  { %870 = vsyncpa [#allocation5 + $0x1], 1 }

</bundles_post_ra>
